<compile_context>
chip_gen: v6e
topology: v6e:2x2x1
jax: 0.10.0
libtpu: 0.0.40
codegen_flags: <defaults>
</compile_context>

<pallas_src>
import jax
import jax.numpy as jnp
from jax.experimental import pallas as pl
from jax.experimental.pallas import tpu as pltpu

STOP_PAD = 128  # lane-dense width for the 2-logit stop head


# ----------------------------------------------------------------------------
# Pallas kernel: fused LSTM step + topic head + stop head
# ----------------------------------------------------------------------------
def sentence_kernel(
    # inputs
    x_ref,        # (B, E)        context (batch padded to 16 sublanes), f32
    prev_h_ref,   # (B, H)        prev_hidden_state, f32
    h0_ref,       # (B, H)        LSTM h state, f32 (aliased to h_out)
    c0_ref,       # (B, H)        LSTM c state, f32 (aliased to c_out)
    w_x_ref,      # (E, 4H+E)     [W_ih^T | W_topic_context^T], bf16, i/f/o cols pre-scaled 0.5
    w_hh_ref,     # (H, 4H)       W_hh^T, bf16, i/f/o cols pre-scaled 0.5
    w_h_ref,      # (H, 2E)       [W_topic_lstm^T | W_stop_s^T], bf16
    w_s1_ref,     # (H, E)        W_stop_s_1^T, bf16
    w_stop_ref,   # (E, 128)      W_stop^T zero-padded to 128 columns, bf16
    b_gates_ref,  # (1, 4H)       b_ih + b_hh, f32, i/f/o cols pre-scaled 0.5
    b_heads_ref,  # (1, 2E)       [b_topic_lstm+b_topic_context | b_stop_s_1+b_stop_s], f32
    b_stop_ref,   # (1, 128)      b_stop zero-padded, f32
    # outputs
    h_out_ref,    # (B, H)
    c_out_ref,    # (B, H)
    topic_ref,    # (B, E)
    pstop_ref,    # (B, 128)      lane-dense; [:, :2] are the real logits
):
    f32 = jnp.float32
    cdt = w_x_ref.dtype  # MXU operand dtype (bf16)

    x = x_ref[...].astype(cdt)
    prev_h = prev_h_ref[...].astype(cdt)
    h0 = h0_ref[...].astype(cdt)
    c0 = c0_ref[...].astype(f32)

    H = h0_ref.shape[-1]
    E = x_ref.shape[-1]
    HH = 4 * H

    # ---- fused matmuls feeding the LSTM gates + topic-context term ---------
    mm_x = jnp.dot(x, w_x_ref[...], preferred_element_type=f32)       # (B, 4H+E)
    mm_h0 = jnp.dot(h0, w_hh_ref[...], preferred_element_type=f32)    # (B, 4H)

    gates = mm_x[:, :HH] + mm_h0 + b_gates_ref[...]                   # (B, 4H)
    topic_ctx = mm_x[:, HH:]                                          # (B, E)

    # ---- single tanh pass over the whole gate slab --------------------------
    # PyTorch gate order: i, f, g, o.  i/f/o columns were pre-scaled by 0.5 in
    # the packer, so sigmoid(z) = 0.5*(1 + tanh(z/2)) needs only this one tanh.
    t = jnp.tanh(gates)

    if H % 128 == 0:
        # Production sizes: vreg-aligned slices, no lane movement needed.
        i_g = 0.5 * (t[:, 0 * H:1 * H] + 1.0)
        f_g = 0.5 * (t[:, 1 * H:2 * H] + 1.0)
        g_g = t[:, 2 * H:3 * H]
        o_g = 0.5 * (t[:, 3 * H:4 * H] + 1.0)
    else:
        # Small H: map tanh->sigmoid with a lane mask, then align gate blocks
        # to lane 0 via XLU rolls and take offset-0 slices.
        lane = jax.lax.broadcasted_iota(jnp.int32, t.shape, 1)
        is_g = (lane >= 2 * H) & (lane < 3 * H)
        act = jnp.where(is_g, t, 0.5 * (t + 1.0))                     # (B, 4H)
        i_g = act[:, :H]
        o_g = pltpu.roll(act, shift=H, axis=1)[:, :H]
        g_g = pltpu.roll(act, shift=2 * H, axis=1)[:, :H]
        f_g = pltpu.roll(act, shift=3 * H, axis=1)[:, :H]

    c_new = f_g * c0 + i_g * g_g
    h_new = o_g * jnp.tanh(c_new)

    h_out_ref[...] = h_new.astype(h_out_ref.dtype)
    c_out_ref[...] = c_new.astype(c_out_ref.dtype)

    # ---- heads: one fused matmul on h_new, split afterwards ----------------
    mm_h = jnp.dot(h_new.astype(cdt), w_h_ref[...],
                   preferred_element_type=f32) + b_heads_ref[...]     # (B, 2E)

    topic = jnp.tanh(mm_h[:, :E] + topic_ctx)
    topic_ref[...] = topic.astype(topic_ref.dtype)

    mm_s1 = jnp.dot(prev_h, w_s1_ref[...], preferred_element_type=f32)  # (B, E)
    s = jnp.tanh(mm_h[:, E:] + mm_s1)

    # lane-dense stop head: (E, 128) weights (zero-padded columns)
    pstop = jnp.dot(s.astype(cdt), w_stop_ref[...],
                    preferred_element_type=f32) + b_stop_ref[...]
    pstop_ref[...] = pstop.astype(pstop_ref.dtype)


# ----------------------------------------------------------------------------
# One-time weight packing (hoisted out of the per-step hot path)
# ----------------------------------------------------------------------------
def pack_params(params, compute_dtype=jnp.bfloat16):
    """Transpose / fuse / pre-scale the module parameters once.

    The 0.5 pre-scale of the i/f/o gate columns (sigmoid via tanh(z/2)) is
    folded here; powers of two are exact in bf16 so no extra rounding."""
    f32 = jnp.float32
    w_ih_t = params["w_ih"].T.astype(f32)      # (E, 4H)
    w_hh_t = params["w_hh"].T.astype(f32)      # (H, 4H)
    b_gates = (params["b_ih"] + params["b_hh"]).astype(f32)  # (4H,)

    H = params["w_hh"].shape[1]
    E = params["w_ih"].shape[1]

    col = jnp.arange(4 * H)
    is_g = (col >= 2 * H) & (col < 3 * H)
    scale = jnp.where(is_g, 1.0, 0.5).astype(f32)
    w_ih_t = w_ih_t * scale[None, :]
    w_hh_t = w_hh_t * scale[None, :]
    b_gates = b_gates * scale

    w_x = jnp.concatenate(
        [w_ih_t, params["w_topic_context"].T.astype(f32)], axis=1
    ).astype(compute_dtype)                                       # (E, 4H+E)
    w_hh = w_hh_t.astype(compute_dtype)                           # (H, 4H)
    w_h = jnp.concatenate(
        [params["w_topic_lstm"].T, params["w_stop_s"].T], axis=1
    ).astype(compute_dtype)                                       # (H, 2E)
    w_s1 = params["w_stop_s_1"].T.astype(compute_dtype)           # (H, E)
    w_stop = (
        jnp.zeros((E, STOP_PAD), f32).at[:, :2].set(params["w_stop"].T)
    ).astype(compute_dtype)                                       # (E, 128)

    b_heads = jnp.concatenate(
        [params["b_topic_lstm"] + params["b_topic_context"],
         params["b_stop_s_1"] + params["b_stop_s"]]
    )[None, :].astype(f32)                                        # (1, 2E)
    b_stop = jnp.zeros((1, STOP_PAD), f32).at[0, :2].set(params["b_stop"])
    b_gates = b_gates[None, :]                                    # (1, 4H)

    return {"w_x": w_x, "w_hh": w_hh, "w_h": w_h, "w_s1": w_s1,
            "w_stop": w_stop, "b_gates": b_gates, "b_heads": b_heads,
            "b_stop": b_stop}


# ----------------------------------------------------------------------------
# Per-step wrapper (hot path: only padding + pallas_call + slicing)
# ----------------------------------------------------------------------------
@jax.jit
def sentence_module_forward(context, prev_hidden_state, packed, states=None):
    """context: (B, E); prev_hidden_state: (B, 1, H); states: None or (h0, c0)
    with h0/c0 of shape (num_layers=1, B, H).  Returns
    (hidden_state (B,1,H), (h_n, c_n), topic (B,E), p_stop (B,1,2))."""
    B, E = context.shape
    H = packed["w_hh"].shape[0]
    dtype = context.dtype

    if states is None:
        h0 = jnp.zeros((B, H), dtype)
        c0 = jnp.zeros((B, H), dtype)
    else:
        h0 = states[0][0]
        c0 = states[1][0]

    prev_h = prev_hidden_state.reshape(B, H)

    # Pad batch to a multiple of 16 sublanes (bf16 vreg packing), sliced back.
    B_pad = ((B + 15) // 16) * 16
    pad = B_pad - B

    def _pad_rows(a):
        return a if pad == 0 else jnp.pad(a, ((0, pad), (0, 0)))

    context_p = _pad_rows(context)
    prev_h_p = _pad_rows(prev_h)
    h0_p = _pad_rows(h0)
    c0_p = _pad_rows(c0)

    inputs = (context_p, prev_h_p, h0_p, c0_p,
              packed["w_x"], packed["w_hh"], packed["w_h"],
              packed["w_s1"], packed["w_stop"],
              packed["b_gates"], packed["b_heads"], packed["b_stop"])

    out_shapes = (
        jax.ShapeDtypeStruct((B_pad, H), dtype),         # h_new
        jax.ShapeDtypeStruct((B_pad, H), dtype),         # c_new
        jax.ShapeDtypeStruct((B_pad, E), dtype),         # topic
        jax.ShapeDtypeStruct((B_pad, STOP_PAD), dtype),  # p_stop (lane-dense)
    )

    vmem = pltpu.MemorySpace.VMEM
    h_new, c_new, topic, pstop = pl.pallas_call(
        sentence_kernel,
        out_shape=out_shapes,
        in_specs=[pl.BlockSpec(memory_space=vmem)] * len(inputs),
        out_specs=[pl.BlockSpec(memory_space=vmem)] * len(out_shapes),
        # h0 -> h_out, c0 -> c_out: update recurrent state in place.
        input_output_aliases={2: 0, 3: 1},
        compiler_params=pltpu.CompilerParams(
            vmem_limit_bytes=64 * 1024 * 1024),
    )(*inputs)

    h_new = h_new[:B]
    c_new = c_new[:B]
    topic = topic[:B]
    p_stop = pstop[:B, :2].reshape(B, 1, 2)

    hidden_state = h_new.reshape(B, 1, H)
    new_states = (h_new[None, :, :], c_new[None, :, :])
    return hidden_state, new_states, topic, p_stop


# ----------------------------------------------------------------------------
# Pure-JAX f32 reference (mirrors the PyTorch forward) for a correctness check
# ----------------------------------------------------------------------------
def reference_forward(context, prev_hidden_state, params, states=None):
    B, E = context.shape
    H = params["w_hh"].shape[1]
    if states is None:
        h0 = jnp.zeros((B, H), context.dtype)
        c0 = jnp.zeros((B, H), context.dtype)
    else:
        h0, c0 = states[0][0], states[1][0]

    gates = (context @ params["w_ih"].T + params["b_ih"]
             + h0 @ params["w_hh"].T + params["b_hh"])
    i_g = jax.nn.sigmoid(gates[:, 0 * H:1 * H])
    f_g = jax.nn.sigmoid(gates[:, 1 * H:2 * H])
    g_g = jnp.tanh(gates[:, 2 * H:3 * H])
    o_g = jax.nn.sigmoid(gates[:, 3 * H:4 * H])
    c = f_g * c0 + i_g * g_g
    h = o_g * jnp.tanh(c)

    topic = jnp.tanh(h @ params["w_topic_lstm"].T + params["b_topic_lstm"]
                     + context @ params["w_topic_context"].T + params["b_topic_context"])
    prev_h = prev_hidden_state.reshape(B, H)
    s = jnp.tanh(prev_h @ params["w_stop_s_1"].T + params["b_stop_s_1"]
                 + h @ params["w_stop_s"].T + params["b_stop_s"])
    p_stop = s @ params["w_stop"].T + params["b_stop"]
    return h.reshape(B, 1, H), (h[None], c[None]), topic, p_stop.reshape(B, 1, 2)


# ----------------------------------------------------------------------------
# Deterministic parameter construction (shapes match nn.Module __init__)
# ----------------------------------------------------------------------------
def make_params(key, attn_emb_size, lstm_sent_h_size, init_linear=0.1):
    E, H = attn_emb_size, lstm_sent_h_size
    il = abs(init_linear)
    stdv = 1.0 / jnp.sqrt(jnp.asarray(H, jnp.float32))
    ks = jax.random.split(key, 16)
    u = lambda k, shape, a: jax.random.uniform(k, shape, jnp.float32, -a, a)
    # TODO(synk): lstm_sent_n_layers fixed to 1 (dropout inactive per module's condition).
    return {
        # LSTM (num_layers = 1)
        "w_ih": u(ks[0], (4 * H, E), stdv),
        "w_hh": u(ks[1], (4 * H, H), stdv),
        "b_ih": u(ks[2], (4 * H,), stdv),
        "b_hh": u(ks[3], (4 * H,), stdv),
        # Linear heads (weights ~ U(-il, il) per _init_linear; default biases)
        "w_topic_lstm": u(ks[4], (E, H), il),
        "b_topic_lstm": u(ks[5], (E,), stdv),
        "w_topic_context": u(ks[6], (E, E), il),
        "b_topic_context": u(ks[7], (E,), stdv),
        "w_stop_s_1": u(ks[8], (E, H), il),
        "b_stop_s_1": u(ks[9], (E,), stdv),
        "w_stop_s": u(ks[10], (E, H), il),
        "b_stop_s": u(ks[11], (E,), stdv),
        "w_stop": u(ks[12], (2, E), il),
        "b_stop": u(ks[13], (2,), stdv),
    }


if __name__ == "__main__":
    B = 2                 # batch
    E = 32                # attn_emb_size
    H = 32                # lstm_sent_h_size

    key = jax.random.PRNGKey(0)
    k_ctx, k_prev, k_par, k_h, k_c = jax.random.split(key, 5)

    context = jax.random.normal(k_ctx, (B, E), jnp.float32)
    prev_hidden_state = jax.random.normal(k_prev, (B, 1, H), jnp.float32)
    params = make_params(k_par, E, H, init_linear=0.1)

    # One-time weight packing (cached / reused across recurrent steps).
    packed = jax.tree_util.tree_map(jax.block_until_ready, pack_params(params))

    # bf16 MXU operands (f32 accumulation) -> loosened tolerance vs f32 reference.
    TOL = 2e-2

    # ---- states = None path -------------------------------------------------
    hidden_state, states, topic, p_stop = sentence_module_forward(
        context, prev_hidden_state, packed, states=None
    )
    jax.block_until_ready((hidden_state, states, topic, p_stop))

    r_h, r_states, r_topic, r_pstop = reference_forward(
        context, prev_hidden_state, params, states=None
    )
    assert jnp.allclose(hidden_state, r_h, atol=TOL)
    assert jnp.allclose(states[0], r_states[0], atol=TOL)
    assert jnp.allclose(states[1], r_states[1], atol=TOL)
    assert jnp.allclose(topic, r_topic, atol=TOL)
    assert jnp.allclose(p_stop, r_pstop, atol=TOL)

    # ---- explicit states path (second recurrent step) -----------------------
    st = (0.1 * jax.random.normal(k_h, (1, B, H), jnp.float32),
          0.1 * jax.random.normal(k_c, (1, B, H), jnp.float32))
    hidden_state2, states2, topic2, p_stop2 = sentence_module_forward(
        context, prev_hidden_state, packed, states=st
    )
    jax.block_until_ready((hidden_state2, states2, topic2, p_stop2))
    r_h2, r_states2, r_topic2, r_pstop2 = reference_forward(
        context, prev_hidden_state, params, states=st
    )
    assert jnp.allclose(hidden_state2, r_h2, atol=TOL)
    assert jnp.allclose(states2[0], r_states2[0], atol=TOL)
    assert jnp.allclose(states2[1], r_states2[1], atol=TOL)
    assert jnp.allclose(topic2, r_topic2, atol=TOL)
    assert jnp.allclose(p_stop2, r_pstop2, atol=TOL)

    print("KERNEL_OK")
</pallas_src>

<mosaic_0001>
module attributes {stable_mosaic.version = 11 : i64} {
  func.func @sentence_kernel(%arg0: memref<16x32xf32, #tpu.memory_space<vmem>>, %arg1: memref<16x32xf32, #tpu.memory_space<vmem>>, %arg2: memref<16x32xf32, #tpu.memory_space<vmem>>, %arg3: memref<16x32xf32, #tpu.memory_space<vmem>>, %arg4: memref<32x160xbf16, #tpu.memory_space<vmem>>, %arg5: memref<32x128xbf16, #tpu.memory_space<vmem>>, %arg6: memref<32x64xbf16, #tpu.memory_space<vmem>>, %arg7: memref<32x32xbf16, #tpu.memory_space<vmem>>, %arg8: memref<32x128xbf16, #tpu.memory_space<vmem>>, %arg9: memref<1x128xf32, #tpu.memory_space<vmem>>, %arg10: memref<1x64xf32, #tpu.memory_space<vmem>>, %arg11: memref<1x128xf32, #tpu.memory_space<vmem>>, %arg12: memref<16x32xf32, #tpu.memory_space<vmem>>, %arg13: memref<16x32xf32, #tpu.memory_space<vmem>>, %arg14: memref<16x32xf32, #tpu.memory_space<vmem>>, %arg15: memref<16x128xf32, #tpu.memory_space<vmem>>) attributes {dimension_semantics = [], scalar_prefetch = 0 : i64, scratch_operands = 0 : i64, tpu.core_type = #tpu.core_type<tc>} {
    %c0 = arith.constant 0 : index
    %c0_0 = arith.constant 0 : index
    %0 = vector.load %arg0[%c0, %c0_0] : memref<16x32xf32, #tpu.memory_space<vmem>>, vector<16x32xf32>
    %1 = arith.truncf %0 : vector<16x32xf32> to vector<16x32xbf16>
    %c0_1 = arith.constant 0 : index
    %c0_2 = arith.constant 0 : index
    %2 = vector.load %arg1[%c0_1, %c0_2] : memref<16x32xf32, #tpu.memory_space<vmem>>, vector<16x32xf32>
    %3 = arith.truncf %2 : vector<16x32xf32> to vector<16x32xbf16>
    %c0_3 = arith.constant 0 : index
    %c0_4 = arith.constant 0 : index
    %4 = vector.load %arg2[%c0_3, %c0_4] : memref<16x32xf32, #tpu.memory_space<vmem>>, vector<16x32xf32>
    %5 = arith.truncf %4 : vector<16x32xf32> to vector<16x32xbf16>
    %c0_5 = arith.constant 0 : index
    %c0_6 = arith.constant 0 : index
    %6 = vector.load %arg3[%c0_5, %c0_6] : memref<16x32xf32, #tpu.memory_space<vmem>>, vector<16x32xf32>
    %c0_7 = arith.constant 0 : index
    %c0_8 = arith.constant 0 : index
    %7 = vector.load %arg4[%c0_7, %c0_8] : memref<32x160xbf16, #tpu.memory_space<vmem>>, vector<32x160xbf16>
    %cst = arith.constant dense<0.000000e+00> : vector<16x160xf32>
    %8 = tpu.matmul %1, %7, %cst {dimension_numbers = #tpu.dot_dimension_numbers<[1], [0], [0], [1], [0, 0, 1, 1], [], []>} : vector<16x32xbf16>, vector<32x160xbf16>, vector<16x160xf32> -> vector<16x160xf32>
    %c0_9 = arith.constant 0 : index
    %c0_10 = arith.constant 0 : index
    %9 = vector.load %arg5[%c0_9, %c0_10] : memref<32x128xbf16, #tpu.memory_space<vmem>>, vector<32x128xbf16>
    %cst_11 = arith.constant dense<0.000000e+00> : vector<16x128xf32>
    %10 = tpu.matmul %5, %9, %cst_11 {dimension_numbers = #tpu.dot_dimension_numbers<[1], [0], [0], [1], [0, 0, 1, 1], [], []>} : vector<16x32xbf16>, vector<32x128xbf16>, vector<16x128xf32> -> vector<16x128xf32>
    %11 = vector.extract_strided_slice %8 {offsets = [0, 0], sizes = [16, 128], strides = [1, 1]} : vector<16x160xf32> to vector<16x128xf32>
    %12 = arith.addf %11, %10 : vector<16x128xf32>
    %c0_12 = arith.constant 0 : index
    %c0_13 = arith.constant 0 : index
    %13 = vector.load %arg9[%c0_12, %c0_13] : memref<1x128xf32, #tpu.memory_space<vmem>>, vector<1x128xf32>
    %14 = vector.broadcast %13 : vector<1x128xf32> to vector<16x128xf32>
    %15 = arith.addf %12, %14 : vector<16x128xf32>
    %16 = vector.extract_strided_slice %8 {offsets = [0, 128], sizes = [16, 32], strides = [1, 1]} : vector<16x160xf32> to vector<16x32xf32>
    %17 = math.tanh %15 : vector<16x128xf32>
    %18 = tpu.iota {dimensions = array<i32: 1>} : vector<16x128xi32>
    %c64_i32 = arith.constant 64 : i32
    %19 = vector.broadcast %c64_i32 : i32 to vector<16x128xi32>
    %20 = arith.cmpi sge, %18, %19 : vector<16x128xi32>
    %c96_i32 = arith.constant 96 : i32
    %21 = vector.broadcast %c96_i32 : i32 to vector<16x128xi32>
    %22 = arith.cmpi slt, %18, %21 : vector<16x128xi32>
    %23 = arith.andi %20, %22 : vector<16x128xi1>
    %cst_14 = arith.constant 1.000000e+00 : f32
    %24 = vector.broadcast %cst_14 : f32 to vector<16x128xf32>
    %25 = arith.addf %17, %24 : vector<16x128xf32>
    %cst_15 = arith.constant 5.000000e-01 : f32
    %26 = vector.broadcast %cst_15 : f32 to vector<16x128xf32>
    %27 = arith.mulf %26, %25 : vector<16x128xf32>
    %28 = arith.select %23, %17, %27 : vector<16x128xi1>, vector<16x128xf32>
    %29 = vector.extract_strided_slice %28 {offsets = [0, 0], sizes = [16, 32], strides = [1, 1]} : vector<16x128xf32> to vector<16x32xf32>
    %c32_i32 = arith.constant 32 : i32
    %30 = tpu.dynamic_rotate %28 by %c32_i32 dim 1 : vector<16x128xf32>, i32 -> vector<16x128xf32>
    %31 = vector.extract_strided_slice %30 {offsets = [0, 0], sizes = [16, 32], strides = [1, 1]} : vector<16x128xf32> to vector<16x32xf32>
    %c64_i32_16 = arith.constant 64 : i32
    %32 = tpu.dynamic_rotate %28 by %c64_i32_16 dim 1 : vector<16x128xf32>, i32 -> vector<16x128xf32>
    %33 = vector.extract_strided_slice %32 {offsets = [0, 0], sizes = [16, 32], strides = [1, 1]} : vector<16x128xf32> to vector<16x32xf32>
    %c96_i32_17 = arith.constant 96 : i32
    %34 = tpu.dynamic_rotate %28 by %c96_i32_17 dim 1 : vector<16x128xf32>, i32 -> vector<16x128xf32>
    %35 = vector.extract_strided_slice %34 {offsets = [0, 0], sizes = [16, 32], strides = [1, 1]} : vector<16x128xf32> to vector<16x32xf32>
    %36 = arith.mulf %35, %6 : vector<16x32xf32>
    %37 = arith.mulf %29, %33 : vector<16x32xf32>
    %38 = arith.addf %36, %37 : vector<16x32xf32>
    %39 = math.tanh %38 : vector<16x32xf32>
    %40 = arith.mulf %31, %39 : vector<16x32xf32>
    %c0_18 = arith.constant 0 : index
    %c0_19 = arith.constant 0 : index
    %41 = vector.load %arg12[%c0_18, %c0_19] : memref<16x32xf32, #tpu.memory_space<vmem>>, vector<16x32xf32>
    tpu.vector_store %arg12[%c0_18, %c0_19], %40 {strides = array<i32>} : memref<16x32xf32, #tpu.memory_space<vmem>>, vector<16x32xf32>,
    %c0_20 = arith.constant 0 : index
    %c0_21 = arith.constant 0 : index
    %42 = vector.load %arg13[%c0_20, %c0_21] : memref<16x32xf32, #tpu.memory_space<vmem>>, vector<16x32xf32>
    tpu.vector_store %arg13[%c0_20, %c0_21], %38 {strides = array<i32>} : memref<16x32xf32, #tpu.memory_space<vmem>>, vector<16x32xf32>,
    %43 = arith.truncf %40 : vector<16x32xf32> to vector<16x32xbf16>
    %c0_22 = arith.constant 0 : index
    %c0_23 = arith.constant 0 : index
    %44 = vector.load %arg6[%c0_22, %c0_23] : memref<32x64xbf16, #tpu.memory_space<vmem>>, vector<32x64xbf16>
    %cst_24 = arith.constant dense<0.000000e+00> : vector<16x64xf32>
    %45 = tpu.matmul %43, %44, %cst_24 {dimension_numbers = #tpu.dot_dimension_numbers<[1], [0], [0], [1], [0, 0, 1, 1], [], []>} : vector<16x32xbf16>, vector<32x64xbf16>, vector<16x64xf32> -> vector<16x64xf32>
    %c0_25 = arith.constant 0 : index
    %c0_26 = arith.constant 0 : index
    %46 = vector.load %arg10[%c0_25, %c0_26] : memref<1x64xf32, #tpu.memory_space<vmem>>, vector<1x64xf32>
    %47 = vector.broadcast %46 : vector<1x64xf32> to vector<16x64xf32>
    %48 = arith.addf %45, %47 : vector<16x64xf32>
    %49 = vector.extract_strided_slice %48 {offsets = [0, 0], sizes = [16, 32], strides = [1, 1]} : vector<16x64xf32> to vector<16x32xf32>
    %50 = arith.addf %49, %16 : vector<16x32xf32>
    %51 = math.tanh %50 : vector<16x32xf32>
    %c0_27 = arith.constant 0 : index
    %c0_28 = arith.constant 0 : index
    %52 = vector.load %arg14[%c0_27, %c0_28] : memref<16x32xf32, #tpu.memory_space<vmem>>, vector<16x32xf32>
    tpu.vector_store %arg14[%c0_27, %c0_28], %51 {strides = array<i32>} : memref<16x32xf32, #tpu.memory_space<vmem>>, vector<16x32xf32>,
    %c0_29 = arith.constant 0 : index
    %c0_30 = arith.constant 0 : index
    %53 = vector.load %arg7[%c0_29, %c0_30] : memref<32x32xbf16, #tpu.memory_space<vmem>>, vector<32x32xbf16>
    %cst_31 = arith.constant dense<0.000000e+00> : vector<16x32xf32>
    %54 = tpu.matmul %3, %53, %cst_31 {dimension_numbers = #tpu.dot_dimension_numbers<[1], [0], [0], [1], [0, 0, 1, 1], [], []>} : vector<16x32xbf16>, vector<32x32xbf16>, vector<16x32xf32> -> vector<16x32xf32>
    %55 = vector.extract_strided_slice %48 {offsets = [0, 32], sizes = [16, 32], strides = [1, 1]} : vector<16x64xf32> to vector<16x32xf32>
    %56 = arith.addf %55, %54 : vector<16x32xf32>
    %57 = math.tanh %56 : vector<16x32xf32>
    %58 = arith.truncf %57 : vector<16x32xf32> to vector<16x32xbf16>
    %c0_32 = arith.constant 0 : index
    %c0_33 = arith.constant 0 : index
    %59 = vector.load %arg8[%c0_32, %c0_33] : memref<32x128xbf16, #tpu.memory_space<vmem>>, vector<32x128xbf16>
    %cst_34 = arith.constant dense<0.000000e+00> : vector<16x128xf32>
    %60 = tpu.matmul %58, %59, %cst_34 {dimension_numbers = #tpu.dot_dimension_numbers<[1], [0], [0], [1], [0, 0, 1, 1], [], []>} : vector<16x32xbf16>, vector<32x128xbf16>, vector<16x128xf32> -> vector<16x128xf32>
    %c0_35 = arith.constant 0 : index
    %c0_36 = arith.constant 0 : index
    %61 = vector.load %arg11[%c0_35, %c0_36] : memref<1x128xf32, #tpu.memory_space<vmem>>, vector<1x128xf32>
    %62 = vector.broadcast %61 : vector<1x128xf32> to vector<16x128xf32>
    %63 = arith.addf %60, %62 : vector<16x128xf32>
    %c0_37 = arith.constant 0 : index
    %c0_38 = arith.constant 0 : index
    %64 = vector.load %arg15[%c0_37, %c0_38] : memref<16x128xf32, #tpu.memory_space<vmem>>, vector<16x128xf32>
    tpu.vector_store %arg15[%c0_37, %c0_38], %63 {strides = array<i32>} : memref<16x128xf32, #tpu.memory_space<vmem>>, vector<16x128xf32>,
    return
  }
}

</mosaic_0001>

<bundles_post_ra>
// kernel: sentence_module_forward.1
= control target key start
LH: loop header
LB: loop body
LE: loop exit
PB: predicated region body
PF: predicated region fallthrough
CT: control target
= control target key end

     0   :  { %21 = vsyncpa [#allocation3], 0  ;;  %s612_s18 = smov [#allocation2]   ;;  %s827_s0 = inlined_call_operand.vmem [shape: f32[16,32], index: 0, kind: input, shape index: {}]   ;;  %s828_s1 = inlined_call_operand.vmem [shape: f32[16,32], index: 1, kind: input, shape index: {}]   ;;  %s829_s2 = inlined_call_operand.vmem [shape: f32[16,32], index: 2, kind: input, shape index: {}, may-alias: {2,12}]   ;;  %s830_s3 = inlined_call_operand.vmem [shape: f32[16,32], index: 3, kind: input, shape index: {}, may-alias: {3,13}]   ;;  %s831_s4 = inlined_call_operand.vmem [shape: bf16[32,160], index: 4, kind: input, shape index: {}]   ;;  %s832_s5 = inlined_call_operand.vmem [shape: bf16[32,128], index: 5, kind: input, shape index: {}]   ;;  %s833_s6 = inlined_call_operand.vmem [shape: bf16[32,64], index: 6, kind: input, shape index: {}]   ;;  %s834_s7 = inlined_call_operand.vmem [shape: bf16[32,32], index: 7, kind: input, shape index: {}]   ;;  %s835_s8 = inlined_call_operand.hbm [shape: bf16[32,128], index: 8, kind: input, shape index: {}]   ;;  %s836_s9 = inlined_call_operand.vmem [shape: f32[1,128], index: 9, kind: input, shape index: {}]   ;;  %s837_s10 = inlined_call_operand.vmem [shape: f32[1,64], index: 10, kind: input, shape index: {}]   ;;  %s838_s11 = inlined_call_operand.vmem [shape: f32[1,128], index: 11, kind: input, shape index: {}]   ;;  %s839_s12 = inlined_call_operand.vmem [shape: f32[16,32], index: 12, kind: output, shape index: {0}, may-alias: {2,12}]   ;;  %s840_s13 = inlined_call_operand.vmem [shape: f32[16,32], index: 13, kind: output, shape index: {1}, may-alias: {3,13}]   ;;  %s841_s14 = inlined_call_operand.vmem [shape: f32[16,32], index: 14, kind: output, shape index: {2}]   ;;  %s842_s15 = inlined_call_operand.vmem [shape: f32[16,128], index: 15, kind: output, shape index: {3}]  }
   0x1   :  { %s43_s19 = sshll.u32 %s612_s18, 4  ;;  %s44_s19 = int_to_ptr.vmem [resolvable:$true] %s43_s19 }
   0x2   :  { %s598_s20 = scalar_lea.vmem %s44_s19, 256  ;;  %p603_p1 = scmp.lt.s32.totalorder %s44_s19, %s44_s19 }
   0x3   :  { %p599_p0 = scmp.ne.s32.totalorder %s44_s19, %s598_s20  ;;  %p604_p2 = scmp.lt.s32.totalorder %s598_s20, %s598_s20 }
   0x5   :  { %p605_p3 = por %p604_p2, %p603_p1 }
   0x7   :  { %p606_p4 = pnand %p605_p3, %p599_p0 }
   0x9   :  { %609 = shalt.err (!%p606_p4)
}
   0xa   :  { %s613_s21 = smov 64   ;;  %s614_s22 = smov 4  }
   0xb   :  { %49 = dma.hbm_to_vmem [thread:$0]  %s835_s8, 256, %s44_s19, [#allocation3], %s613_s21, %s613_s21, %s614_s22  }
   0xc   :  { %610 = dma.done.wait [#allocation3], 256  }
   0xd   :  { %611 = vsyncadd [#allocation3], 4294967040  ;;  %v615_v0 = vmov 0.0   ;;  %vm616_vm0 = vmmov 0   ;;  %v617_v1 = vmov 0   ;;  %v562_v3 = vld [vmem:[%s832_s5 + $0x8] sm:$0xff]   ;;  %v215_v31 = vlaneseq }
   0xe   :  { %520 = vmatprep.subr.bf16.mxu1 %v615_v0  ;;  %524 = vmatprep.mubr.msk.bf16.mxu1 %vm616_vm0, %v615_v0  ;;  %v560_v2 = vld [vmem:[%s831_s4 + $0x14] ss:$8 sps:$4 sm:$0xff]   ;;  %v563_v4 = vld [vmem:[%s831_s4 + $0x10] ss:$8 sps:$4 sm:$0xff]   ;;  %v564_v5 = vld [vmem:[%s831_s4 + $0x4] ss:$8 sps:$4 sm:$0xff]  }
   0xf   :  { %131 = vmatprep.mubr.bf16.mxu0 %v617_v1  ;;  %111 = vmatprep.subr.bf16.mxu0 %v560_v2  ;;  %v566_v6 = vld [vmem:[%s832_s5] sm:$0xff]   ;;  %v67_v9 = vld [vmem:[%s829_s2 + $0x8] sm:$0xff]  ;;  %vm95_vm1 = vcmask 261120   ;;  %v216_v32 = vand.u32 127, %v215_v31  ;;  %s619_s20 = smov 32  }
  0x10   :  { %521 = vmatpush3.bf16.msra.mxu1 %v562_v3  ;;  %112 = vmatpush1.bf16.msra.mxu0 %v563_v4  ;;  %v567_v7 = vld [vmem:[%s831_s4] ss:$8 sps:$4 sm:$0xff]  }
  0x11   :  { %522 = vmatprep.subr.bf16.mxu1 %v615_v0  ;;  %v66_v8 = vld [vmem:[%s829_s2] sm:$0xff]  ;;  %113 = vmatprep.subr.bf16.mxu0 %v564_v5  ;;  %v61_v11 = vld [vmem:[%s827_s0 + $0x8] sm:$0xff]  ;;  %vm217_vm2 = vcmp.ge.s32.totalorder %v216_v32, 64  ;;  %vm218_vm3 = vcmp.lt.s32.totalorder %v216_v32, 96 }
  0x12   :  { %v60_v10 = vld [vmem:[%s827_s0] sm:$0xff]  ;;  %v68_v12 = vpack.c.bf16 %v67_v9, %v66_v8  ;;  %v568_v14 = vld [vmem:[%s834_s7 + $0x8] sm:$0xff]   ;;  %vm219_vm4 = vmand %vm217_vm2, %vm218_vm3 }
  0x13   :  { %v62_v13 = vpack.c.bf16 %v61_v11, %v60_v10  ;;  %v569_v15 = vld [vmem:[%s834_s7] sm:$0xff]   ;;  %v64_v17 = vld [vmem:[%s828_s1 + $0x8] sm:$0xff] }
  0x14   :  { %523 = vmatpush3.bf16.msra.mxu1 %v566_v6  ;;  %114 = vmatpush1.bf16.msra.mxu0 %v567_v7  ;;  %v63_v16 = vld [vmem:[%s828_s1] sm:$0xff]  ;;  %s618_s1 = smov 96   ;;  %v570_v41 = vld [vmem:[%s833_s6 + $0x8] sm:$0xff]  }
  0x15   :  { %536 = vmatprep.subr.bf16.mxu1 %v615_v0  ;;  %528 = vmatprep.subr.bf16.mxu0 %v615_v0  ;;  %v65_v18 = vpack.c.bf16 %v64_v17, %v63_v16  ;;  %v496_v21 = vld [vmem:[%s836_s9] ss:$0 sm:$0xff]  ;;  %v70_v52 = vld [vmem:[%s830_s3 + $0x8] sm:$0xff] }
  0x16   :  { %v571_v42 = vld [vmem:[%s833_s6] sm:$0xff]   ;;  %v572_v3 = vld [vmem:[#allocation2 + $0x8] sm:$0xff]  }
  0x17   :  { %525 = vmatmul.mubr.msk.bf16.vlgmr.msra.gmra.mxu1 %vm95_vm1, %v68_v12  ;;  %492 = vmatmul.mubr.msk.bf16.vlgmr.msra.gmra.mxu0 %vm95_vm1, %v62_v13  ;;  %v69_v47 = vld [vmem:[%s830_s3] sm:$0xff] }
  0x18   :  { %540 = vmatprep.mubr.msk.bf16.mxu1 %vm616_vm0, %v615_v0  ;;  %532 = vmatprep.mubr.msk.bf16.mxu0 %vm616_vm0, %v615_v0  ;;  %v573_v4 = vld [vmem:[#allocation2] sm:$0xff]  }
  0x19   :  { %537 = vmatpush3.bf16.msra.mxu1 %v568_v14  ;;  %529 = vmatpush3.bf16.msra.mxu0 %v570_v41  ;;  %v497_v6 = vld [vmem:[%s837_s10] ss:$0 sm:$0xff] }
  0x1a   :  { %538 = vmatprep.subr.bf16.mxu1 %v615_v0  ;;  %530 = vmatprep.subr.bf16.mxu0 %v615_v0 }
  0x1d   :  { %539 = vmatpush3.bf16.msra.mxu1 %v569_v15  ;;  %531 = vmatpush3.bf16.msra.mxu0 %v571_v42 }
  0x1e   :  { %544 = vmatprep.subr.bf16.mxu0 %v615_v0 }
  0x20   :  { %541 = vmatmul.mubr.msk.bf16.vlgmr.msra.gmra.mxu1 %vm95_vm1, %v65_v18 }
  0xd7   :  { %v195_v19 = vpop.f32.mrf.mxu1  ;;  %v133_v20 = vpop.f32.mrf.mxu0 }
  0xd8   :  { %v202_v22 = vadd.f32 %v195_v19, %v133_v20 }
  0xd9   :  { %v526_v23 = vpop.f32.mrf.mxu1  ;;  %v764_v24 = vpop.f32.mrf.mxu0 }
  0xda   :  { %v211_v25 = vadd.f32 %v496_v21, %v202_v22 }
  0xdb   :  { %v198_v26 = vpop.f32.mrf.mxu1  ;;  %v137_v27 = vpop.f32.mrf.mxu0 }
  0xdc   :  { %574 = vtanh.f32 %v211_v25  ;;  %v203_v28 = vadd.f32 %v198_v26, %v137_v27 }
  0xdd   :  { %v527_v29 = vpop.f32.mrf.mxu1  ;;  %v139_v5 = vpop.f32.mrf.mxu0 }
  0xde   :  { %v212_v30 = vadd.f32 %v496_v21, %v203_v28 }
  0xe0   :  { %576 = vtanh.f32 %v212_v30  ;;  %v379_v43 = vpop.f32.mrf.mxu1 }
  0xe2   :  { %v542_v44 = vpop.f32.mrf.mxu1 }
  0xe4   :  { %v382_v45 = vpop.f32.mrf.mxu1 }
  0xe6   :  { %v543_v46 = vpop.f32.mrf.mxu1 }
  0xe9   :  { %v575_v33 = vpop.eup %574 }
  0xea   :  { %v220_v34 = vadd.f32 1.0, %v575_v33 }
  0xec   :  { %v222_v35 = vmul.f32 0.5, %v220_v34 }
  0xed   :  { %v577_v36 = vpop.eup %576 }
  0xee   :  { %v224_v37 = vsel %vm219_vm4, %v575_v33, %v222_v35  ;;  %v221_v38 = vadd.f32 1.0, %v577_v36 }
  0xef   :  { %234 = vrot.lane.b32.xlu1 %v224_v37, %s618_s1  ;;  %230 = vrot.lane.b32.xlu0 %v224_v37, %s613_s21 }
  0xf0   :  { %v223_v39 = vmul.f32 0.5, %v221_v38 }
  0xf2   :  { %v225_v40 = vsel %vm219_vm4, %v577_v36, %v223_v39 }
  0xf3   :  { %236 = vrot.lane.b32.xlu1 %v225_v40, %s618_s1  ;;  %232 = vrot.lane.b32.xlu0 %v225_v40, %s613_s21 }
  0xf7   :  { %228 = vrot.lane.b32.xlu1 %v225_v40, %s619_s20  ;;  %226 = vrot.lane.b32.xlu0 %v224_v37, %s619_s20 }
  0xfb   :  { %388 = vrot.lane.b32.xlu0 %v379_v43, %s619_s20  ;;  %390 = vrot.lane.b32.xlu1 %v382_v45, %s619_s20 }
 0x161   :  { %v235_v48 = vpop.permute.xlu1 %234  ;;  %v231_v49 = vpop.permute.xlu0 %230 }
 0x162   :  { %v238_v50 = vmul.f32 %v235_v48, %v69_v47  ;;  %v240_v51 = vmul.f32 %v231_v49, %v224_v37 }
 0x164   :  { %v242_v53 = vadd.f32 %v240_v51, %v238_v50 }
 0x165   :  { %v237_v54 = vpop.permute.xlu1 %236  ;;  %v233_v55 = vpop.permute.xlu0 %232 }
 0x166   :  { %578 = vtanh.f32 %v242_v53  ;;  %250 = vst.msk [vmem:[%s840_s13] sm:$0xff] %vm95_vm1, %v242_v53  ;;  %v239_v56 = vmul.f32 %v237_v54, %v70_v52  ;;  %v241_v57 = vmul.f32 %v233_v55, %v225_v40 }
 0x168   :  { %v243_v58 = vadd.f32 %v241_v57, %v239_v56 }
 0x169   :  { %v227_v60 = vpop.permute.xlu0 %226  ;;  %v229_v63 = vpop.permute.xlu1 %228 }
 0x16a   :  { %580 = vtanh.f32 %v243_v58  ;;  %251 = vst.msk [vmem:[%s840_s13 + $0x8] sm:$0xff] %vm95_vm1, %v243_v58 }
 0x16d   :  { %v389_v9 = vpop.permute.xlu0 %388  ;;  %v391_v15 = vpop.permute.xlu1 %390 }
 0x173   :  { %v579_v59 = vpop.eup %578 }
 0x174   :  { %v246_v61 = vmul.f32 %v579_v59, %v227_v60 }
 0x176   :  { %248 = vst.msk [vmem:[%s839_s12] sm:$0xff] %vm95_vm1, %v246_v61 }
 0x177   :  { %v581_v62 = vpop.eup %580 }
 0x178   :  { %v247_v1 = vmul.f32 %v581_v62, %v229_v63 }
 0x17a   :  { %249 = vst.msk [vmem:[%s839_s12 + $0x8] sm:$0xff] %vm95_vm1, %v247_v1  ;;  %v252_v2 = vpack.c.bf16 %v247_v1, %v246_v61 }
 0x17c   :  { %533 = vmatmul.mubr.msk.bf16.vlgmr.msra.gmra.mxu0 %vm95_vm1, %v252_v2 }
 0x17d   :  { %548 = vmatprep.mubr.msk.bf16.mxu0 %vm616_vm0, %v615_v0  ;;  %545 = vmatpush3.bf16.msra.mxu0 %v572_v3 }
 0x17e   :  { %546 = vmatprep.subr.bf16.mxu0 %v615_v0 }
 0x181   :  { %547 = vmatpush3.bf16.msra.mxu0 %v573_v4 }
 0x23c   :  { %v313_v7 = vpop.f32.mrf.mxu0 }
 0x23d   :  { %v314_v8 = vadd.f32 %v497_v6, %v313_v7 }
 0x23e   :  { %v534_v10 = vpop.f32.mrf.mxu0 }
 0x23f   :  { %v320_v11 = vadd.f32 %v314_v8, %v764_v24  ;;  %v394_v12 = vadd.f32 %v389_v9, %v314_v8  ;;  %v504_v24 = vld [vmem:[%s838_s11] ss:$0 sm:$0xff] }
 0x240   :  { %v316_v13 = vpop.f32.mrf.mxu0 }
 0x241   :  { %582 = vtanh.f32 %v320_v11  ;;  %v317_v14 = vadd.f32 %v497_v6, %v316_v13 }
 0x242   :  { %v535_v16 = vpop.f32.mrf.mxu0  ;;  %584 = vtanh.f32 %v394_v12 }
 0x243   :  { %v321_v17 = vadd.f32 %v317_v14, %v139_v5  ;;  %v395_v0 = vadd.f32 %v391_v15, %v317_v14 }
 0x245   :  { %586 = vtanh.f32 %v321_v17 }
 0x246   :  { %588 = vtanh.f32 %v395_v0 }
 0x24e   :  { %v583_v18 = vpop.eup %582 }
 0x24f   :  { %324 = vst.msk [vmem:[%s841_s14] sm:$0xff] %vm95_vm1, %v583_v18  ;;  %v585_v19 = vpop.eup %584 }
 0x252   :  { %v587_v20 = vpop.eup %586 }
 0x253   :  { %v589_v21 = vpop.eup %588  ;;  %325 = vst.msk [vmem:[%s841_s14 + $0x8] sm:$0xff] %vm95_vm1, %v587_v20 }
 0x254   :  { %v398_v22 = vpack.c.bf16 %v589_v21, %v585_v19 }
 0x256   :  { %411 = vrot.lane.b32.xlu0 %v398_v22, %s618_s1 }
 0x2c8   :  { %v412_v23 = vpop.permute.xlu0 %411 }
 0x2c9   :  { %549 = vmatmul.mubr.msk.bf16.vlgmr.msra.gmra.mxu0 %vm95_vm1, %v412_v23 }
 0x389   :  { %v462_v25 = vpop.f32.mrf.mxu0 }
 0x38a   :  { %v463_v26 = vadd.f32 %v504_v24, %v462_v25 }
 0x38b   :  { %v550_v27 = vpop.f32.mrf.mxu0 }
 0x38c   :  { %469 = vst [vmem:[%s842_s15] sm:$0xff] %v463_v26 }
 0x38d   :  { %v465_v28 = vpop.f32.mrf.mxu0 }
 0x38e   :  { %v466_v29 = vadd.f32 %v504_v24, %v465_v28 }
 0x38f   :  { %v551_v30 = vpop.f32.mrf.mxu0 }
 0x390   :  { %470 = vst [vmem:[%s842_s15 + $0x8] sm:$0xff] %v466_v29 }
 0x391   :  { %487 = vsyncpa [#allocation3], 1 }

</bundles_post_ra>
